<compile_context>
chip_gen: v7x
topology: tpu7x:2x2x1
jax: 0.10.0
libtpu: 0.0.40
codegen_flags: <defaults>
</compile_context>

<pallas_src>
import functools

import jax
import jax.numpy as jnp
from jax.experimental import pallas as pl
from jax.experimental.pallas import tpu as pltpu

_LANES = 128
_SUB = 32          # rows per vreg-resident sub-chunk inside the streaming kernel


def _cdiv(a, b):
    return (a + b - 1) // b


def _round_up(x, m):
    return ((x + m - 1) // m) * m


def _vfl_prod(x, z, lbl, alpha, gamma):
    """Elementwise BCE_with_logits(x, z) * varifocal weight, computed in f32."""
    x = x.astype(jnp.float32)        # logits
    z = z.astype(jnp.float32)        # soft targets (gt_score)
    lbl = lbl.astype(jnp.float32)    # label mask
    e = jnp.exp(-jnp.abs(x))         # one exp shared by sigmoid and the BCE log term
    # Numerically stable sigmoid: x>=0 -> 1/(1+e), x<0 -> e/(1+e).
    sig = jnp.where(x >= 0.0, 1.0, e) / (1.0 + e)
    if gamma == 2.0:
        sig_pow = sig * sig          # avoid the exp/log of jnp.power for the default
    else:
        sig_pow = jnp.power(sig, gamma)
    a_sp = alpha * sig_pow
    # == alpha*sig^gamma*(1-lbl) + z*lbl, with one fewer multiply.
    weight = a_sp + lbl * (z - a_sp)
    # Stable binary_cross_entropy_with_logits, reduction='none':
    #   max(x, 0) - x*z + log(1 + exp(-|x|))
    bce = jnp.maximum(x, 0.0) - x * z + jnp.log1p(e)
    return bce * weight


def _make_small_kernel(alpha, gamma):
    """Single-block kernel for tiny inputs (fewer than _SUB full rows)."""
    def kernel(pred_ref, gt_ref, label_ref, out_ref):
        prod = _vfl_prod(pred_ref[...], gt_ref[...], label_ref[...], alpha, gamma)
        out_ref[...] = jnp.sum(prod, axis=0, keepdims=True)   # (1, 128) partial
    return kernel


def _make_stream_kernel(alpha, gamma, block_rows, total_rows, num_blocks):
    """Streaming kernel: each grid step reduces one (block_rows, 128) tile to (8, 128)."""
    n_sub = block_rows // _SUB
    last_valid = total_rows - (num_blocks - 1) * block_rows   # valid rows in last block
    need_mask = last_valid < block_rows                       # partial tail block?

    def kernel(pred_ref, gt_ref, label_ref, out_ref):
        def block_sum(valid_limit):
            # Hoisted, loop-invariant row-index plane (only needed when masking).
            base = None
            if valid_limit is not None:
                base = jax.lax.broadcasted_iota(jnp.int32, (_SUB, _LANES), 0)

            def body(s, acc):
                r0 = pl.multiple_of(s * _SUB, _SUB)
                prod = _vfl_prod(pred_ref[pl.ds(r0, _SUB), :],
                                 gt_ref[pl.ds(r0, _SUB), :],
                                 label_ref[pl.ds(r0, _SUB), :],
                                 alpha, gamma)
                if valid_limit is not None:
                    # Select (not multiply): garbage/NaN in OOB rows cannot leak.
                    prod = jnp.where(base + r0 < valid_limit, prod, 0.0)
                return acc + jnp.sum(prod.reshape(_SUB // 8, 8, _LANES), axis=0)

            return jax.lax.fori_loop(0, n_sub, body,
                                     jnp.zeros((8, _LANES), jnp.float32))

        if need_mask:
            i = pl.program_id(0)

            @pl.when(i < num_blocks - 1)
            def _():
                out_ref[0] = block_sum(None)

            @pl.when(i == num_blocks - 1)
            def _():
                out_ref[0] = block_sum(last_valid)
        else:
            out_ref[0] = block_sum(None)

    return kernel


@functools.partial(jax.jit, static_argnames=("alpha", "gamma", "max_block_rows"))
def varifocal_loss(pred_score, gt_score, label, alpha=0.75, gamma=2.0,
                   max_block_rows=2048):
    """Pallas implementation of VarifocalLoss.forward. Returns a scalar f32."""
    assert pred_score.shape == gt_score.shape == label.shape
    alpha = float(alpha)
    gamma = float(gamma)

    n = pred_score.size
    if n == 0:
        return jnp.float32(0.0)

    n_main = (n // _LANES) * _LANES
    rows = n_main // _LANES

    p = pred_score.reshape(-1)
    g = gt_score.reshape(-1)
    l = label.reshape(-1)

    # <128-element remainder (usually empty): plain-JAX sum, avoids padding the bulk.
    tail = None
    if n_main < n:
        tail = jnp.sum(_vfl_prod(p[n_main:], g[n_main:], l[n_main:], alpha, gamma))

    if rows == 0:
        return tail

    p2 = p[:n_main].reshape(rows, _LANES)
    g2 = g[:n_main].reshape(rows, _LANES)
    l2 = l[:n_main].reshape(rows, _LANES)

    if rows < _SUB:
        # Tiny input: one full-array block, straight-line body.
        part = pl.pallas_call(
            _make_small_kernel(alpha, gamma),
            out_shape=jax.ShapeDtypeStruct((1, _LANES), jnp.float32),
        )(p2, g2, l2)
        total = jnp.sum(part)
        return total + tail if tail is not None else total

    # Streaming path: balanced blocks, block_rows a multiple of _SUB and <= rows,
    # so blocks never exceed the array; the (only) partial tail block is masked.
    max_rows = max(_SUB, (int(max_block_rows) // _SUB) * _SUB)
    cap = (rows // _SUB) * _SUB
    num_blocks = _cdiv(rows, max_rows)
    block_rows = min(_round_up(_cdiv(rows, num_blocks), _SUB), cap, max_rows)
    num_blocks = _cdiv(rows, block_rows)
    block_rows = min(_round_up(_cdiv(rows, num_blocks), _SUB), cap, max_rows)
    num_blocks = _cdiv(rows, block_rows)
    assert block_rows % _SUB == 0 and _SUB <= block_rows <= rows

    in_spec = pl.BlockSpec((block_rows, _LANES), lambda i: (i, 0))
    partials = pl.pallas_call(
        _make_stream_kernel(alpha, gamma, block_rows, rows, num_blocks),
        out_shape=jax.ShapeDtypeStruct((num_blocks, 8, _LANES), jnp.float32),
        grid=(num_blocks,),
        in_specs=[in_spec, in_spec, in_spec],
        out_specs=pl.BlockSpec((1, 8, _LANES), lambda i: (i, 0, 0)),
        compiler_params=pltpu.CompilerParams(
            dimension_semantics=("parallel",),          # both TCs on v7x
            vmem_limit_bytes=32 * 1024 * 1024,
            allow_input_fusion=[True, True, True],      # fuse reshape producers
        ),
    )(p2, g2, l2)

    total = jnp.sum(partials)
    return total + tail if tail is not None else total


def varifocal_loss_ref(pred_score, gt_score, label, alpha=0.75, gamma=2.0):
    """Pure-JAX reference mirroring the PyTorch module (independent formulation)."""
    x = pred_score.astype(jnp.float32)
    z = gt_score.astype(jnp.float32)
    lbl = label.astype(jnp.float32)
    weight = alpha * jnp.power(jax.nn.sigmoid(x), gamma) * (1.0 - lbl) + z * lbl
    bce = jnp.maximum(x, 0.0) - x * z + jnp.log1p(jnp.exp(-jnp.abs(x)))
    return jnp.sum(bce * weight)


if __name__ == "__main__":
    # Primary example: detection-style (batch=2, num_anchors=16, num_classes=80).
    k1, k2, k3 = jax.random.split(jax.random.PRNGKey(0), 3)
    B, A, C = 2, 16, 80
    pred_score = jax.random.normal(k1, (B, A, C), dtype=jnp.float32)
    gt_score = jax.random.uniform(k2, (B, A, C), dtype=jnp.float32)
    label = (jax.random.uniform(k3, (B, A, C)) > 0.7).astype(jnp.float32)

    loss = jax.block_until_ready(varifocal_loss(pred_score, gt_score, label))
    ref = varifocal_loss_ref(pred_score, gt_score, label)
    assert jnp.allclose(loss, ref, rtol=1e-4, atol=1e-3), (loss, ref)

    # Second check exercises the streaming path explicitly (multi-block grid,
    # partial tail-block masking, sub-chunk fori_loop, "parallel" semantics).
    k4, k5, k6 = jax.random.split(jax.random.PRNGKey(1), 3)
    B2, A2, C2 = 2, 208, 80
    pred2 = jax.random.normal(k4, (B2, A2, C2), dtype=jnp.float32)
    gt2 = jax.random.uniform(k5, (B2, A2, C2), dtype=jnp.float32)
    label2 = (jax.random.uniform(k6, (B2, A2, C2)) > 0.7).astype(jnp.float32)

    loss2 = jax.block_until_ready(
        varifocal_loss(pred2, gt2, label2, max_block_rows=128))
    ref2 = varifocal_loss_ref(pred2, gt2, label2)
    assert jnp.allclose(loss2, ref2, rtol=1e-4, atol=1e-3), (loss2, ref2)

    print("KERNEL_OK")
</pallas_src>

<mosaic_0001>
module attributes {stable_mosaic.version = 11 : i64} {
  func.func @kernel(%arg0: memref<20x128xf32, #tpu.memory_space<vmem>>, %arg1: memref<20x128xf32, #tpu.memory_space<vmem>>, %arg2: memref<20x128xf32, #tpu.memory_space<vmem>>, %arg3: memref<1x128xf32, #tpu.memory_space<vmem>>) attributes {dimension_semantics = [], scalar_prefetch = 0 : i64, scratch_operands = 0 : i64, tpu.core_type = #tpu.core_type<tc>} {
    %c0 = arith.constant 0 : index
    %c0_0 = arith.constant 0 : index
    %0 = vector.load %arg0[%c0, %c0_0] : memref<20x128xf32, #tpu.memory_space<vmem>>, vector<20x128xf32>
    %c0_1 = arith.constant 0 : index
    %c0_2 = arith.constant 0 : index
    %1 = vector.load %arg1[%c0_1, %c0_2] : memref<20x128xf32, #tpu.memory_space<vmem>>, vector<20x128xf32>
    %c0_3 = arith.constant 0 : index
    %c0_4 = arith.constant 0 : index
    %2 = vector.load %arg2[%c0_3, %c0_4] : memref<20x128xf32, #tpu.memory_space<vmem>>, vector<20x128xf32>
    %3 = math.absf %0 : vector<20x128xf32>
    %cst = arith.constant 0.000000e+00 : f32
    %4 = vector.broadcast %cst : f32 to vector<20x128xf32>
    %5 = arith.subf %4, %3 : vector<20x128xf32>
    %6 = math.exp %5 : vector<20x128xf32>
    %cst_5 = arith.constant 0.000000e+00 : f32
    %7 = vector.broadcast %cst_5 : f32 to vector<20x128xf32>
    %8 = arith.cmpf oge, %0, %7 : vector<20x128xf32>
    %cst_6 = arith.constant 1.000000e+00 : f32
    %9 = vector.broadcast %cst_6 : f32 to vector<20x128xf32>
    %10 = arith.select %8, %9, %6 : vector<20x128xi1>, vector<20x128xf32>
    %cst_7 = arith.constant 1.000000e+00 : f32
    %11 = vector.broadcast %cst_7 : f32 to vector<20x128xf32>
    %12 = arith.addf %11, %6 : vector<20x128xf32>
    %13 = arith.divf %10, %12 : vector<20x128xf32>
    %14 = arith.mulf %13, %13 : vector<20x128xf32>
    %cst_8 = arith.constant 7.500000e-01 : f32
    %15 = vector.broadcast %cst_8 : f32 to vector<20x128xf32>
    %16 = arith.mulf %15, %14 : vector<20x128xf32>
    %17 = arith.subf %1, %16 : vector<20x128xf32>
    %18 = arith.mulf %2, %17 : vector<20x128xf32>
    %19 = arith.addf %16, %18 : vector<20x128xf32>
    %cst_9 = arith.constant 0.000000e+00 : f32
    %20 = vector.broadcast %cst_9 : f32 to vector<20x128xf32>
    %21 = arith.maximumf %0, %20 : vector<20x128xf32>
    %22 = arith.mulf %0, %1 : vector<20x128xf32>
    %23 = arith.subf %21, %22 : vector<20x128xf32>
    %24 = math.log1p %6 : vector<20x128xf32>
    %25 = arith.addf %23, %24 : vector<20x128xf32>
    %26 = arith.mulf %25, %19 : vector<20x128xf32>
    %cst_10 = arith.constant dense<0.000000e+00> : vector<128xf32>
    %27 = vector.multi_reduction <add>, %26, %cst_10 [0] : vector<20x128xf32> to vector<128xf32>
    %28 = vector.shape_cast %27 : vector<128xf32> to vector<1x128xf32>
    %c0_11 = arith.constant 0 : index
    %c0_12 = arith.constant 0 : index
    %29 = vector.load %arg3[%c0_11, %c0_12] : memref<1x128xf32, #tpu.memory_space<vmem>>, vector<1x128xf32>
    tpu.vector_store %arg3[%c0_11, %c0_12], %28 {strides = array<i32>} : memref<1x128xf32, #tpu.memory_space<vmem>>, vector<1x128xf32>,
    return
  }
}

</mosaic_0001>

<bundles_post_ra>
// kernel: varifocal_loss.1
= control target key start
LH: loop header
LB: loop body
LE: loop exit
PB: predicated region body
PF: predicated region fallthrough
CT: control target
= control target key end

     0   :  { %vm108_vm6 = vcmask 1043456   ;;  %s220_s0 = inlined_call_operand.vmem [shape: f32[20,128], index: 0, kind: input, shape index: {}]   ;;  %s221_s1 = inlined_call_operand.vmem [shape: f32[20,128], index: 1, kind: input, shape index: {}]   ;;  %s222_s2 = inlined_call_operand.vmem [shape: f32[20,128], index: 2, kind: input, shape index: {}]   ;;  %s223_s3 = inlined_call_operand.vmem [shape: f32[1,128], index: 3, kind: output, shape index: {}]  }
   0x1   :  { %v14_v0 = vld [vmem:[%s220_s0] sm:$0xff]  ;;  %v166_v1 = vld [vmem:[%s220_s0 + $0x8] sm:$0xff]  ;;  %v171_v2 = vld [vmem:[%s220_s0 + $0x10] sm:$0xf] }
   0x2   :  { %v23_v3 = vand.u32 2147483647, %v14_v0  ;;  %v24_v4 = vand.u32 2147483647, %v166_v1  ;;  %v25_v5 = vand.u32 2147483647, %v171_v2 }
   0x3   :  { %v17_v19 = vld [vmem:[%s221_s1] sm:$0xff]  ;;  %vm35_vm0 = vcmp.ge.f32.partialorder %v14_v0, 0.0  ;;  %vm36_vm1 = vcmp.ge.f32.partialorder %v166_v1, 0.0  ;;  %v18_v22 = vld [vmem:[%s221_s1 + $0x8] sm:$0xff]  ;;  %vm37_vm2 = vcmp.ge.f32.partialorder %v171_v2, 0.0  ;;  %v65_v25 = vmax.f32 %v14_v0, 0.0 }
   0x4   :  { %v26_v6 = vsub.f32 0.0, %v23_v3  ;;  %v27_v7 = vsub.f32 0.0, %v24_v4  ;;  %v28_v8 = vsub.f32 0.0, %v25_v5  ;;  %v19_v23 = vld [vmem:[%s221_s1 + $0x10] sm:$0xf]  ;;  %v68_v26 = vmul.f32 %v17_v19, %v14_v0  ;;  %v20_v61 = vld [vmem:[%s222_s2] sm:$0xff] }
   0x5   :  { %v69_v33 = vmul.f32 %v18_v22, %v166_v1  ;;  %v66_v38 = vmax.f32 %v166_v1, 0.0  ;;  %v70_v39 = vmul.f32 %v19_v23, %v171_v2  ;;  %v67_v43 = vmax.f32 %v171_v2, 0.0  ;;  %v21_v2 = vld [vmem:[%s222_s2 + $0x8] sm:$0xff] }
   0x6   :  { %v29_v9 = vmul.f32 1.442695, %v26_v6  ;;  %v31_v10 = vmul.f32 1.442695, %v27_v7  ;;  %v33_v11 = vmul.f32 1.442695, %v28_v8  ;;  %v71_v44 = vsub.f32 %v65_v25, %v68_v26 }
   0x7   :  { %v72_v63 = vsub.f32 %v66_v38, %v69_v33  ;;  %v73_v5 = vsub.f32 %v67_v43, %v70_v39  ;;  %v22_v7 = vld [vmem:[%s222_s2 + $0x10] sm:$0xf] }
   0x8   :  { %122 = vpow2.f32 %v29_v9 }
   0x9   :  { %124 = vpow2.f32 %v31_v10 }
   0xa   :  { %126 = vpow2.f32 %v33_v11 }
  0x12   :  { %v123_v12 = vpop.eup %122 }
  0x13   :  { %v125_v13 = vpop.eup %124  ;;  %v41_v14 = vadd.f32 1.0, %v123_v12  ;;  %v77_v18 = vmul.f32 -0.5, %v123_v12  ;;  %v38_v24 = vsel %vm35_vm0, 1.0, %v123_v12  ;;  %v80_v29 = vand.u32 2147483647, %v123_v12 }
  0x14   :  { %v127_v15 = vpop.eup %126  ;;  %v42_v16 = vadd.f32 1.0, %v125_v13  ;;  %v86_v20 = vmul.f32 -0.5, %v125_v13  ;;  %v39_v28 = vsel %vm36_vm1, 1.0, %v125_v13  ;;  %v89_v34 = vand.u32 2147483647, %v125_v13 }
  0x15   :  { %v43_v17 = vadd.f32 1.0, %v127_v15  ;;  %128 = vrcp.f32 %v41_v14  ;;  %v95_v21 = vmul.f32 -0.5, %v127_v15  ;;  %v78_v27 = vadd.f32 1.0, %v77_v18 }
  0x16   :  { %130 = vrcp.f32 %v42_v16  ;;  %v87_v30 = vadd.f32 1.0, %v86_v20  ;;  %v40_v32 = vsel %vm37_vm2, 1.0, %v127_v15  ;;  %v98_v40 = vand.u32 2147483647, %v127_v15 }
  0x17   :  { %132 = vrcp.f32 %v43_v17  ;;  %v96_v35 = vadd.f32 1.0, %v95_v21  ;;  %v79_v45 = vmul.f32 %v123_v12, %v78_v27  ;;  %vm190_vm3 = vcmp.lt.f32.partialorder %v80_v29, 0.0004427343 }
  0x18   :  { %134 = vlog2.f32 %v41_v14  ;;  %v88_v50 = vmul.f32 %v125_v13, %v87_v30  ;;  %vm194_vm4 = vcmp.lt.f32.partialorder %v89_v34, 0.0004427343  ;;  %vm198_vm5 = vcmp.lt.f32.partialorder %v98_v40, 0.0004427343 }
  0x19   :  { %136 = vlog2.f32 %v42_v16  ;;  %v97_v55 = vmul.f32 %v127_v15, %v96_v35 }
  0x1a   :  { %138 = vlog2.f32 %v43_v17 }
  0x1f   :  { %v129_v31 = vpop.eup %128 }
  0x20   :  { %v131_v36 = vpop.eup %130  ;;  %v45_v37 = vmul.f32 %v129_v31, %v38_v24 }
  0x21   :  { %v133_v41 = vpop.eup %132  ;;  %v47_v42 = vmul.f32 %v131_v36, %v39_v28 }
  0x22   :  { %v135_v46 = vpop.eup %134  ;;  %v49_v47 = vmul.f32 %v133_v41, %v40_v32  ;;  %v50_v48 = vmul.f32 %v45_v37, %v45_v37 }
  0x23   :  { %v137_v51 = vpop.eup %136  ;;  %v51_v52 = vmul.f32 %v47_v42, %v47_v42  ;;  %v76_v53 = vmul.f32 0.6931472, %v135_v46 }
  0x24   :  { %v139_v56 = vpop.eup %138  ;;  %v52_v57 = vmul.f32 %v49_v47, %v49_v47  ;;  %v53_v58 = vmul.f32 0.75, %v50_v48  ;;  %v85_v59 = vmul.f32 0.6931472, %v137_v51 }
  0x25   :  { %v54_v62 = vmul.f32 0.75, %v51_v52  ;;  %v82_v0 = vsel %vm190_vm3, %v79_v45, %v76_v53  ;;  %v94_v1 = vmul.f32 0.6931472, %v139_v56 }
  0x26   :  { %v55_v3 = vmul.f32 0.75, %v52_v57  ;;  %v56_v4 = vsub.f32 %v17_v19, %v53_v58  ;;  %v91_v6 = vsel %vm194_vm4, %v88_v50, %v85_v59  ;;  %v101_v12 = vadd.f32 %v82_v0, %v71_v44 }
  0x27   :  { %v57_v8 = vsub.f32 %v18_v22, %v54_v62  ;;  %v100_v9 = vsel %vm198_vm5, %v97_v55, %v94_v1  ;;  %v102_v14 = vadd.f32 %v91_v6, %v72_v63 }
  0x28   :  { %v58_v10 = vsub.f32 %v19_v23, %v55_v3  ;;  %v59_v11 = vmul.f32 %v56_v4, %v20_v61  ;;  %v103_v17 = vadd.f32 %v100_v9, %v73_v5 }
  0x29   :  { %v60_v13 = vmul.f32 %v57_v8, %v21_v2 }
  0x2a   :  { %v61_v15 = vmul.f32 %v58_v10, %v22_v7  ;;  %v62_v16 = vadd.f32 %v59_v11, %v53_v58 }
  0x2b   :  { %v63_v18 = vadd.f32 %v60_v13, %v54_v62 }
  0x2c   :  { %v64_v19 = vadd.f32 %v61_v15, %v55_v3  ;;  %v104_v20 = vmul.f32 %v101_v12, %v62_v16 }
  0x2d   :  { %v105_v21 = vmul.f32 %v102_v14, %v63_v18 }
  0x2e   :  { %v106_v24 = vmul.f32 %v103_v17, %v64_v19 }
  0x2f   :  { %v107_v25 = vadd.f32 %v105_v21, %v104_v20 }
  0x30   :  { %v109_v26 = vsel %vm108_vm6, %v106_v24, 0.0 }
  0x31   :  { %v110_v22 = vadd.f32 %v109_v26, %v107_v25 }
  0x33   :  { %v111_v27 = vrot.slane %v110_v22, 4 }
  0x35   :  { %v112_v28 = vadd.f32 %v111_v27, %v110_v22 }
  0x37   :  { %v113_v29 = vrot.slane %v112_v28, 2 }
  0x39   :  { %v114_v23 = vadd.f32 %v113_v29, %v112_v28 }
  0x3b   :  { %v115_v30 = vrot.slane %v114_v23, 1 }
  0x3d   :  { %v116_v31 = vadd.f32 %v115_v30, %v114_v23 }
  0x3f   :  { %117 = vst [vmem:[%s223_s3] sm:$0x1] %v116_v31 }

</bundles_post_ra>
